<compile_context>
chip_gen: v7x
topology: tpu7x:2x2x1
jax: 0.10.0
libtpu: 0.0.40
codegen_flags: <defaults>
</compile_context>

<pallas_src>
import functools

import jax
import jax.numpy as jnp
from jax import lax
from jax.experimental import pallas as pl
from jax.experimental.pallas import tpu as pltpu


# ----------------------------------------------------------------------------
# Fused kernel: (event-summed) GRU recurrence + generator MLP
# ----------------------------------------------------------------------------
def _fused_gru_generator_kernel(xz_ref, wih_ref, whh_ref,
                                w1_ref, w2_ref, wo_ref, out_ref):
    """xz_ref : [T+1, E]  rows 0..T-1 = event-summed visit embeddings,
                          row  T      = z_random
       wih_ref: [E+1, GP] rows 0..E-1 = concat(W_ir|W_iz|W_in)  (3E lane-pad GP)
                          row  E      = concat(b_ir+b_hr | b_iz+b_hz | b_in)
       whh_ref: [E+1, GP] rows 0..E-1 = concat(W_hr|W_hz|W_hn)
                          row  E      = concat(0 | 0 | b_hn)
       w1_ref : [D+1, D]  residual generator block 1 (+ bias row), D = 2E
       w2_ref : [D+1, D]  residual generator block 2 (+ bias row)
       wo_ref : [D+1, VP] output projection (+ bias row), V lane-padded to VP
       out_ref: [1, VP]   sigmoid outputs; padded lanes sliced off in glue
    """
    E = whh_ref.shape[0] - 1
    T = xz_ref.shape[0] - 1
    D = w1_ref.shape[1]

    x = xz_ref[0:T, :]                                               # [T, E]
    z = xz_ref[T:T + 1, :]                                           # [1, E]

    # (a) all input-side gate projections hoisted out of the recurrence:
    #     one [T, E] @ [E, GP] matmul with input biases folded in.
    gi = jnp.dot(x, wih_ref[0:E, :],
                 preferred_element_type=jnp.float32) + wih_ref[E:E + 1, :]

    w_hh = whh_ref[0:E, :]                                           # [E, GP]
    b_h = whh_ref[E:E + 1, :]                                        # [1, GP]

    # (b) GRU recurrence, fully unrolled (T is static), one MXU push per step.
    #     PyTorch nn.GRU gate math / order (r, z, n):
    #       r = s(Wir x + bir + Whr h + bhr),  z = s(Wiz x + biz + Whz h + bhz)
    #       n = tanh(Win x + bin + r*(Whn h + bhn)),  h' = (1-z)*n + z*h
    h = jnp.zeros((1, E), dtype=jnp.float32)
    for t in range(T):
        gi_t = gi[t:t + 1, :]                                        # [1, GP]
        gh = jnp.dot(h, w_hh, preferred_element_type=jnp.float32) + b_h
        r = jax.nn.sigmoid(gi_t[:, 0:E] + gh[:, 0:E])
        zg = jax.nn.sigmoid(gi_t[:, E:2 * E] + gh[:, E:2 * E])
        n = jnp.tanh(gi_t[:, 2 * E:3 * E] + r * gh[:, 2 * E:3 * E])
        h = (1.0 - zg) * n + zg * h

    # (c) generator MLP on concat([z_random, last_visit_emb])
    g = jnp.concatenate([z, h], axis=-1)                             # [1, D]
    h1 = jax.nn.relu(
        jnp.dot(g, w1_ref[0:D, :], preferred_element_type=jnp.float32)
        + w1_ref[D:D + 1, :]) + g
    h2 = jax.nn.relu(
        jnp.dot(h1, w2_ref[0:D, :], preferred_element_type=jnp.float32)
        + w2_ref[D:D + 1, :]) + h1
    out_ref[...] = jax.nn.sigmoid(
        jnp.dot(h2, wo_ref[0:D, :], preferred_element_type=jnp.float32)
        + wo_ref[D:D + 1, :])


def _full_spec(shape):
    n = len(shape)
    return pl.BlockSpec(shape, lambda i, _n=n: (0,) * _n)


def fused_forward(xz, wih_aug, whh_aug, w1_aug, w2_aug, wo_aug):
    Tp1, E = xz.shape
    GP = wih_aug.shape[1]
    D = w1_aug.shape[1]
    VP = wo_aug.shape[1]
    return pl.pallas_call(
        _fused_gru_generator_kernel,
        grid=(1,),
        in_specs=[
            _full_spec((Tp1, E)),
            _full_spec((E + 1, GP)), _full_spec((E + 1, GP)),
            _full_spec((D + 1, D)), _full_spec((D + 1, D)),
            _full_spec((D + 1, VP)),
        ],
        out_specs=_full_spec((1, VP)),
        out_shape=jax.ShapeDtypeStruct((1, VP), jnp.float32),
        compiler_params=pltpu.CompilerParams(
            dimension_semantics=("arbitrary",)),
    )(xz, wih_aug, whh_aug, w1_aug, w2_aug, wo_aug)


# ----------------------------------------------------------------------------
# Parameter construction (deterministic, mirrors BuildModel.__init__ shapes)
# ----------------------------------------------------------------------------
def init_params(key, orders, vocab_size, emb_size, padding_idx):
    total_vocab = sum(vocab_size)
    gen_dim = 2 * emb_size                   # bidirectional=False -> [2E, 2E]
    keys = jax.random.split(key, 16)
    k = iter(keys)

    params = {}
    # InputEventEmbedding: one table per order, padding row zeroed
    tables = {}
    for i, o in enumerate(orders):
        t = 0.05 * jax.random.normal(next(k), (vocab_size[i], emb_size),
                                     dtype=jnp.float32)
        tables[o] = t.at[padding_idx].set(0.0)
    params["emb_tables"] = tables

    # RNN (GRU, 1 layer, unidirectional): gate order (r, z, n)
    params["w_ih"] = 0.1 * jax.random.normal(next(k), (3, emb_size, emb_size),
                                             dtype=jnp.float32)
    params["w_hh"] = 0.1 * jax.random.normal(next(k), (3, emb_size, emb_size),
                                             dtype=jnp.float32)
    params["b_ih"] = 0.1 * jax.random.normal(next(k), (3, 1, emb_size),
                                             dtype=jnp.float32)
    params["b_hh"] = 0.1 * jax.random.normal(next(k), (3, 1, emb_size),
                                             dtype=jnp.float32)

    # GAN generator: input 2*emb_size, two residual blocks, out total_vocab
    params["gen_w1"] = 0.1 * jax.random.normal(next(k), (gen_dim, gen_dim),
                                               dtype=jnp.float32)
    params["gen_b1"] = jnp.zeros((1, gen_dim), dtype=jnp.float32)
    params["gen_w2"] = 0.1 * jax.random.normal(next(k), (gen_dim, gen_dim),
                                               dtype=jnp.float32)
    params["gen_b2"] = jnp.zeros((1, gen_dim), dtype=jnp.float32)
    params["gen_wo"] = 0.1 * jax.random.normal(next(k), (gen_dim, total_vocab),
                                               dtype=jnp.float32)
    params["gen_bo"] = jnp.zeros((1, total_vocab), dtype=jnp.float32)
    return params


# ----------------------------------------------------------------------------
# Full forward (glue + single fused kernel)
# ----------------------------------------------------------------------------
def _round_up(n, m):
    return ((n + m - 1) // m) * m


def _pad_lanes(a, width):
    return jnp.pad(a, ((0, 0), (0, width - a.shape[-1])))


@functools.partial(jax.jit, static_argnames=("orders",))
def build_model_forward(params, v_inputs, z_key, orders):
    E = params["w_ih"].shape[2]
    V = params["gen_wo"].shape[1]
    GP = _round_up(3 * E, 128)     # lane-padded gate-concat width
    VP = _round_up(V, 128)         # lane-padded generator output width

    # embedding lookup + event-axis reduction (== torch.sum(concat(embs), 1));
    # done in glue so XLA fuses gather+reduce and the kernel DMA stays tiny.
    x = None
    for o in orders:
        e = jnp.sum(params["emb_tables"][o][v_inputs[o]], axis=1)    # [T, E]
        x = e if x is None else x + e

    # pack GRU weights: gates concatenated on the lane axis, biases folded and
    # appended as the last weight row (one HBM array per operand -> fewer DMAs)
    w_ih, w_hh = params["w_ih"], params["w_hh"]
    b_ih, b_hh = params["b_ih"], params["b_hh"]
    w_ih_cat = _pad_lanes(
        jnp.concatenate([w_ih[0], w_ih[1], w_ih[2]], axis=1), GP)
    b_i_cat = _pad_lanes(
        jnp.concatenate([b_ih[0] + b_hh[0], b_ih[1] + b_hh[1], b_ih[2]],
                        axis=1), GP)
    wih_aug = jnp.concatenate([w_ih_cat, b_i_cat], axis=0)           # [E+1,GP]

    w_hh_cat = _pad_lanes(
        jnp.concatenate([w_hh[0], w_hh[1], w_hh[2]], axis=1), GP)
    zeros_e = jnp.zeros((1, E), dtype=jnp.float32)
    b_h_cat = _pad_lanes(
        jnp.concatenate([zeros_e, zeros_e, b_hh[2]], axis=1), GP)
    whh_aug = jnp.concatenate([w_hh_cat, b_h_cat], axis=0)           # [E+1,GP]

    # generator blocks with bias rows appended; output proj lane-padded so the
    # kernel's final store is lane-dense.
    w1_aug = jnp.concatenate([params["gen_w1"], params["gen_b1"]], axis=0)
    w2_aug = jnp.concatenate([params["gen_w2"], params["gen_b2"]], axis=0)
    wo_aug = jnp.concatenate([_pad_lanes(params["gen_wo"], VP),
                              _pad_lanes(params["gen_bo"], VP)], axis=0)

    # z_random = torch.randn(last_visit_emb.size())   (n = 1); packed as the
    # last row of the visit slab so it rides the same DMA as X.
    z_random = jax.random.normal(z_key, (1, E), dtype=jnp.float32)
    xz = jnp.concatenate([x, z_random], axis=0)                      # [T+1, E]

    x_fake_pad = fused_forward(xz, wih_aug, whh_aug, w1_aug, w2_aug, wo_aug)
    return {"x_fake": x_fake_pad[:, :V]}


# ----------------------------------------------------------------------------
# Pure-JAX reference (no Pallas) for correctness checking
# ----------------------------------------------------------------------------
@functools.partial(jax.jit, static_argnames=("orders",))
def reference_forward(params, v_inputs, z_key, orders):
    dot = lambda a, b: jnp.dot(a, b, precision=lax.Precision.HIGHEST)
    E = params["w_ih"].shape[2]
    x = None
    for o in orders:
        e = jnp.sum(params["emb_tables"][o][v_inputs[o]], axis=1)
        x = e if x is None else x + e
    w_ir, w_iz, w_in = params["w_ih"][0], params["w_ih"][1], params["w_ih"][2]
    w_hr, w_hz, w_hn = params["w_hh"][0], params["w_hh"][1], params["w_hh"][2]
    b_ir, b_iz, b_in = params["b_ih"][0], params["b_ih"][1], params["b_ih"][2]
    b_hr, b_hz, b_hn = params["b_hh"][0], params["b_hh"][1], params["b_hh"][2]
    h = jnp.zeros((1, E), dtype=jnp.float32)
    for t in range(x.shape[0]):
        x_t = x[t:t + 1]
        r = jax.nn.sigmoid(dot(x_t, w_ir) + b_ir + dot(h, w_hr) + b_hr)
        z = jax.nn.sigmoid(dot(x_t, w_iz) + b_iz + dot(h, w_hz) + b_hz)
        n = jnp.tanh(dot(x_t, w_in) + b_in + r * (dot(h, w_hn) + b_hn))
        h = (1.0 - z) * n + z * h
    z_random = jax.random.normal(z_key, (1, E), dtype=jnp.float32)
    g = jnp.concatenate([z_random, h], axis=-1)
    h1 = jax.nn.relu(dot(g, params["gen_w1"]) + params["gen_b1"]) + g
    h2 = jax.nn.relu(dot(h1, params["gen_w2"]) + params["gen_b2"]) + h1
    return jax.nn.sigmoid(dot(h2, params["gen_wo"]) + params["gen_bo"])


# ----------------------------------------------------------------------------
if __name__ == "__main__":
    key = jax.random.PRNGKey(0)
    k_param, k_med, k_diag, k_z = jax.random.split(key, 4)

    orders = ("medication", "diagnosis")
    vocab_size = [12, 20]          # total_vocab_size = 32
    emb_size = 32
    padding_idx = 0
    T = 8                          # number of visits (sequence length)
    events_per_order = 3           # padded events per visit per order

    params = init_params(k_param, orders, vocab_size, emb_size, padding_idx)

    v_inputs = {
        "medication": jax.random.randint(k_med, (T, events_per_order), 0,
                                         vocab_size[0], dtype=jnp.int32),
        "diagnosis": jax.random.randint(k_diag, (T, events_per_order), 0,
                                        vocab_size[1], dtype=jnp.int32),
    }

    out = build_model_forward(params, v_inputs, k_z, orders)
    x_fake = jax.block_until_ready(out["x_fake"])
    x_ref = jax.block_until_ready(reference_forward(params, v_inputs, k_z,
                                                    orders))

    assert x_fake.shape == (1, sum(vocab_size))
    assert bool(jnp.all(jnp.isfinite(x_fake)))
    assert bool(jnp.all((x_fake >= 0.0) & (x_fake <= 1.0)))
    assert bool(jnp.allclose(x_fake, x_ref, atol=1e-3, rtol=1e-3))
    print("KERNEL_OK")
</pallas_src>

<mosaic_0001>
module attributes {stable_mosaic.version = 11 : i64} {
  func.func @_fused_gru_generator_kernel(%arg0: i32, %arg1: memref<9x32xf32, #tpu.memory_space<vmem>>, %arg2: memref<33x128xf32, #tpu.memory_space<vmem>>, %arg3: memref<33x128xf32, #tpu.memory_space<vmem>>, %arg4: memref<65x64xf32, #tpu.memory_space<vmem>>, %arg5: memref<65x64xf32, #tpu.memory_space<vmem>>, %arg6: memref<65x128xf32, #tpu.memory_space<vmem>>, %arg7: memref<1x128xf32, #tpu.memory_space<vmem>>) attributes {dimension_semantics = [#tpu.dimension_semantics<arbitrary>], iteration_bounds = array<i64: 1>, scalar_prefetch = 0 : i64, scratch_operands = 0 : i64, tpu.core_type = #tpu.core_type<tc>, window_params = [{pipeline_mode = #tpu.pipeline_mode<synchronous>, transform_indices = @transform_0, window_bounds = array<i64: 9, 32>}, {pipeline_mode = #tpu.pipeline_mode<synchronous>, transform_indices = @transform_1, window_bounds = array<i64: 33, 128>}, {pipeline_mode = #tpu.pipeline_mode<synchronous>, transform_indices = @transform_2, window_bounds = array<i64: 33, 128>}, {pipeline_mode = #tpu.pipeline_mode<synchronous>, transform_indices = @transform_3, window_bounds = array<i64: 65, 64>}, {pipeline_mode = #tpu.pipeline_mode<synchronous>, transform_indices = @transform_4, window_bounds = array<i64: 65, 64>}, {pipeline_mode = #tpu.pipeline_mode<synchronous>, transform_indices = @transform_5, window_bounds = array<i64: 65, 128>}, {pipeline_mode = #tpu.pipeline_mode<synchronous>, transform_indices = @transform_6, window_bounds = array<i64: 1, 128>}]} {
    %c0 = arith.constant 0 : index
    %c0_0 = arith.constant 0 : index
    %0 = vector.load %arg1[%c0, %c0_0] : memref<9x32xf32, #tpu.memory_space<vmem>>, vector<8x32xf32>
    %c8 = arith.constant 8 : index
    %c0_1 = arith.constant 0 : index
    %1 = vector.load %arg1[%c8, %c0_1] : memref<9x32xf32, #tpu.memory_space<vmem>>, vector<1x32xf32>
    %c0_2 = arith.constant 0 : index
    %c0_3 = arith.constant 0 : index
    %2 = vector.load %arg2[%c0_2, %c0_3] : memref<33x128xf32, #tpu.memory_space<vmem>>, vector<32x128xf32>
    %cst = arith.constant dense<0.000000e+00> : vector<8x128xf32>
    %3 = tpu.matmul %0, %2, %cst {dimension_numbers = #tpu.dot_dimension_numbers<[1], [0], [0], [1], [0, 0, 1, 1], [], []>} : vector<8x32xf32>, vector<32x128xf32>, vector<8x128xf32> -> vector<8x128xf32>
    %c32 = arith.constant 32 : index
    %c0_4 = arith.constant 0 : index
    %4 = vector.load %arg2[%c32, %c0_4] : memref<33x128xf32, #tpu.memory_space<vmem>>, vector<1x128xf32>
    %5 = vector.broadcast %4 : vector<1x128xf32> to vector<8x128xf32>
    %6 = arith.addf %3, %5 : vector<8x128xf32>
    %c0_5 = arith.constant 0 : index
    %c0_6 = arith.constant 0 : index
    %7 = vector.load %arg3[%c0_5, %c0_6] : memref<33x128xf32, #tpu.memory_space<vmem>>, vector<32x128xf32>
    %c32_7 = arith.constant 32 : index
    %c0_8 = arith.constant 0 : index
    %8 = vector.load %arg3[%c32_7, %c0_8] : memref<33x128xf32, #tpu.memory_space<vmem>>, vector<1x128xf32>
    %cst_9 = arith.constant 0.000000e+00 : f32
    %9 = vector.broadcast %cst_9 : f32 to vector<1x32xf32>
    %10 = vector.extract_strided_slice %6 {offsets = [0, 0], sizes = [1, 128], strides = [1, 1]} : vector<8x128xf32> to vector<1x128xf32>
    %cst_10 = arith.constant dense<0.000000e+00> : vector<1x128xf32>
    %11 = tpu.matmul %9, %7, %cst_10 {dimension_numbers = #tpu.dot_dimension_numbers<[1], [0], [0], [1], [0, 0, 1, 1], [], []>} : vector<1x32xf32>, vector<32x128xf32>, vector<1x128xf32> -> vector<1x128xf32>
    %12 = arith.addf %11, %8 : vector<1x128xf32>
    %13 = vector.extract_strided_slice %10 {offsets = [0, 0], sizes = [1, 32], strides = [1, 1]} : vector<1x128xf32> to vector<1x32xf32>
    %14 = vector.extract_strided_slice %12 {offsets = [0, 0], sizes = [1, 32], strides = [1, 1]} : vector<1x128xf32> to vector<1x32xf32>
    %15 = arith.addf %13, %14 : vector<1x32xf32>
    %16 = arith.negf %15 : vector<1x32xf32>
    %17 = math.exp %16 : vector<1x32xf32>
    %cst_11 = arith.constant 1.000000e+00 : f32
    %18 = vector.broadcast %cst_11 : f32 to vector<1x32xf32>
    %19 = arith.addf %18, %17 : vector<1x32xf32>
    %20 = arith.divf %18, %19 : vector<1x32xf32>
    %21 = vector.extract_strided_slice %10 {offsets = [0, 32], sizes = [1, 32], strides = [1, 1]} : vector<1x128xf32> to vector<1x32xf32>
    %22 = vector.extract_strided_slice %12 {offsets = [0, 32], sizes = [1, 32], strides = [1, 1]} : vector<1x128xf32> to vector<1x32xf32>
    %23 = arith.addf %21, %22 : vector<1x32xf32>
    %24 = arith.negf %23 : vector<1x32xf32>
    %25 = math.exp %24 : vector<1x32xf32>
    %cst_12 = arith.constant 1.000000e+00 : f32
    %26 = vector.broadcast %cst_12 : f32 to vector<1x32xf32>
    %27 = arith.addf %26, %25 : vector<1x32xf32>
    %28 = arith.divf %26, %27 : vector<1x32xf32>
    %29 = vector.extract_strided_slice %10 {offsets = [0, 64], sizes = [1, 32], strides = [1, 1]} : vector<1x128xf32> to vector<1x32xf32>
    %30 = vector.extract_strided_slice %12 {offsets = [0, 64], sizes = [1, 32], strides = [1, 1]} : vector<1x128xf32> to vector<1x32xf32>
    %31 = arith.mulf %20, %30 : vector<1x32xf32>
    %32 = arith.addf %29, %31 : vector<1x32xf32>
    %33 = math.tanh %32 : vector<1x32xf32>
    %cst_13 = arith.constant 1.000000e+00 : f32
    %34 = vector.broadcast %cst_13 : f32 to vector<1x32xf32>
    %35 = arith.subf %34, %28 : vector<1x32xf32>
    %36 = arith.mulf %35, %33 : vector<1x32xf32>
    %37 = arith.mulf %28, %9 : vector<1x32xf32>
    %38 = arith.addf %36, %37 : vector<1x32xf32>
    %39 = vector.extract_strided_slice %6 {offsets = [1, 0], sizes = [1, 128], strides = [1, 1]} : vector<8x128xf32> to vector<1x128xf32>
    %cst_14 = arith.constant dense<0.000000e+00> : vector<1x128xf32>
    %40 = tpu.matmul %38, %7, %cst_14 {dimension_numbers = #tpu.dot_dimension_numbers<[1], [0], [0], [1], [0, 0, 1, 1], [], []>} : vector<1x32xf32>, vector<32x128xf32>, vector<1x128xf32> -> vector<1x128xf32>
    %41 = arith.addf %40, %8 : vector<1x128xf32>
    %42 = vector.extract_strided_slice %39 {offsets = [0, 0], sizes = [1, 32], strides = [1, 1]} : vector<1x128xf32> to vector<1x32xf32>
    %43 = vector.extract_strided_slice %41 {offsets = [0, 0], sizes = [1, 32], strides = [1, 1]} : vector<1x128xf32> to vector<1x32xf32>
    %44 = arith.addf %42, %43 : vector<1x32xf32>
    %45 = arith.negf %44 : vector<1x32xf32>
    %46 = math.exp %45 : vector<1x32xf32>
    %cst_15 = arith.constant 1.000000e+00 : f32
    %47 = vector.broadcast %cst_15 : f32 to vector<1x32xf32>
    %48 = arith.addf %47, %46 : vector<1x32xf32>
    %49 = arith.divf %47, %48 : vector<1x32xf32>
    %50 = vector.extract_strided_slice %39 {offsets = [0, 32], sizes = [1, 32], strides = [1, 1]} : vector<1x128xf32> to vector<1x32xf32>
    %51 = vector.extract_strided_slice %41 {offsets = [0, 32], sizes = [1, 32], strides = [1, 1]} : vector<1x128xf32> to vector<1x32xf32>
    %52 = arith.addf %50, %51 : vector<1x32xf32>
    %53 = arith.negf %52 : vector<1x32xf32>
    %54 = math.exp %53 : vector<1x32xf32>
    %cst_16 = arith.constant 1.000000e+00 : f32
    %55 = vector.broadcast %cst_16 : f32 to vector<1x32xf32>
    %56 = arith.addf %55, %54 : vector<1x32xf32>
    %57 = arith.divf %55, %56 : vector<1x32xf32>
    %58 = vector.extract_strided_slice %39 {offsets = [0, 64], sizes = [1, 32], strides = [1, 1]} : vector<1x128xf32> to vector<1x32xf32>
    %59 = vector.extract_strided_slice %41 {offsets = [0, 64], sizes = [1, 32], strides = [1, 1]} : vector<1x128xf32> to vector<1x32xf32>
    %60 = arith.mulf %49, %59 : vector<1x32xf32>
    %61 = arith.addf %58, %60 : vector<1x32xf32>
    %62 = math.tanh %61 : vector<1x32xf32>
    %cst_17 = arith.constant 1.000000e+00 : f32
    %63 = vector.broadcast %cst_17 : f32 to vector<1x32xf32>
    %64 = arith.subf %63, %57 : vector<1x32xf32>
    %65 = arith.mulf %64, %62 : vector<1x32xf32>
    %66 = arith.mulf %57, %38 : vector<1x32xf32>
    %67 = arith.addf %65, %66 : vector<1x32xf32>
    %68 = vector.extract_strided_slice %6 {offsets = [2, 0], sizes = [1, 128], strides = [1, 1]} : vector<8x128xf32> to vector<1x128xf32>
    %cst_18 = arith.constant dense<0.000000e+00> : vector<1x128xf32>
    %69 = tpu.matmul %67, %7, %cst_18 {dimension_numbers = #tpu.dot_dimension_numbers<[1], [0], [0], [1], [0, 0, 1, 1], [], []>} : vector<1x32xf32>, vector<32x128xf32>, vector<1x128xf32> -> vector<1x128xf32>
    %70 = arith.addf %69, %8 : vector<1x128xf32>
    %71 = vector.extract_strided_slice %68 {offsets = [0, 0], sizes = [1, 32], strides = [1, 1]} : vector<1x128xf32> to vector<1x32xf32>
    %72 = vector.extract_strided_slice %70 {offsets = [0, 0], sizes = [1, 32], strides = [1, 1]} : vector<1x128xf32> to vector<1x32xf32>
    %73 = arith.addf %71, %72 : vector<1x32xf32>
    %74 = arith.negf %73 : vector<1x32xf32>
    %75 = math.exp %74 : vector<1x32xf32>
    %cst_19 = arith.constant 1.000000e+00 : f32
    %76 = vector.broadcast %cst_19 : f32 to vector<1x32xf32>
    %77 = arith.addf %76, %75 : vector<1x32xf32>
    %78 = arith.divf %76, %77 : vector<1x32xf32>
    %79 = vector.extract_strided_slice %68 {offsets = [0, 32], sizes = [1, 32], strides = [1, 1]} : vector<1x128xf32> to vector<1x32xf32>
    %80 = vector.extract_strided_slice %70 {offsets = [0, 32], sizes = [1, 32], strides = [1, 1]} : vector<1x128xf32> to vector<1x32xf32>
    %81 = arith.addf %79, %80 : vector<1x32xf32>
    %82 = arith.negf %81 : vector<1x32xf32>
    %83 = math.exp %82 : vector<1x32xf32>
    %cst_20 = arith.constant 1.000000e+00 : f32
    %84 = vector.broadcast %cst_20 : f32 to vector<1x32xf32>
    %85 = arith.addf %84, %83 : vector<1x32xf32>
    %86 = arith.divf %84, %85 : vector<1x32xf32>
    %87 = vector.extract_strided_slice %68 {offsets = [0, 64], sizes = [1, 32], strides = [1, 1]} : vector<1x128xf32> to vector<1x32xf32>
    %88 = vector.extract_strided_slice %70 {offsets = [0, 64], sizes = [1, 32], strides = [1, 1]} : vector<1x128xf32> to vector<1x32xf32>
    %89 = arith.mulf %78, %88 : vector<1x32xf32>
    %90 = arith.addf %87, %89 : vector<1x32xf32>
    %91 = math.tanh %90 : vector<1x32xf32>
    %cst_21 = arith.constant 1.000000e+00 : f32
    %92 = vector.broadcast %cst_21 : f32 to vector<1x32xf32>
    %93 = arith.subf %92, %86 : vector<1x32xf32>
    %94 = arith.mulf %93, %91 : vector<1x32xf32>
    %95 = arith.mulf %86, %67 : vector<1x32xf32>
    %96 = arith.addf %94, %95 : vector<1x32xf32>
    %97 = vector.extract_strided_slice %6 {offsets = [3, 0], sizes = [1, 128], strides = [1, 1]} : vector<8x128xf32> to vector<1x128xf32>
    %cst_22 = arith.constant dense<0.000000e+00> : vector<1x128xf32>
    %98 = tpu.matmul %96, %7, %cst_22 {dimension_numbers = #tpu.dot_dimension_numbers<[1], [0], [0], [1], [0, 0, 1, 1], [], []>} : vector<1x32xf32>, vector<32x128xf32>, vector<1x128xf32> -> vector<1x128xf32>
    %99 = arith.addf %98, %8 : vector<1x128xf32>
    %100 = vector.extract_strided_slice %97 {offsets = [0, 0], sizes = [1, 32], strides = [1, 1]} : vector<1x128xf32> to vector<1x32xf32>
    %101 = vector.extract_strided_slice %99 {offsets = [0, 0], sizes = [1, 32], strides = [1, 1]} : vector<1x128xf32> to vector<1x32xf32>
    %102 = arith.addf %100, %101 : vector<1x32xf32>
    %103 = arith.negf %102 : vector<1x32xf32>
    %104 = math.exp %103 : vector<1x32xf32>
    %cst_23 = arith.constant 1.000000e+00 : f32
    %105 = vector.broadcast %cst_23 : f32 to vector<1x32xf32>
    %106 = arith.addf %105, %104 : vector<1x32xf32>
    %107 = arith.divf %105, %106 : vector<1x32xf32>
    %108 = vector.extract_strided_slice %97 {offsets = [0, 32], sizes = [1, 32], strides = [1, 1]} : vector<1x128xf32> to vector<1x32xf32>
    %109 = vector.extract_strided_slice %99 {offsets = [0, 32], sizes = [1, 32], strides = [1, 1]} : vector<1x128xf32> to vector<1x32xf32>
    %110 = arith.addf %108, %109 : vector<1x32xf32>
    %111 = arith.negf %110 : vector<1x32xf32>
    %112 = math.exp %111 : vector<1x32xf32>
    %cst_24 = arith.constant 1.000000e+00 : f32
    %113 = vector.broadcast %cst_24 : f32 to vector<1x32xf32>
    %114 = arith.addf %113, %112 : vector<1x32xf32>
    %115 = arith.divf %113, %114 : vector<1x32xf32>
    %116 = vector.extract_strided_slice %97 {offsets = [0, 64], sizes = [1, 32], strides = [1, 1]} : vector<1x128xf32> to vector<1x32xf32>
    %117 = vector.extract_strided_slice %99 {offsets = [0, 64], sizes = [1, 32], strides = [1, 1]} : vector<1x128xf32> to vector<1x32xf32>
    %118 = arith.mulf %107, %117 : vector<1x32xf32>
    %119 = arith.addf %116, %118 : vector<1x32xf32>
    %120 = math.tanh %119 : vector<1x32xf32>
    %cst_25 = arith.constant 1.000000e+00 : f32
    %121 = vector.broadcast %cst_25 : f32 to vector<1x32xf32>
    %122 = arith.subf %121, %115 : vector<1x32xf32>
    %123 = arith.mulf %122, %120 : vector<1x32xf32>
    %124 = arith.mulf %115, %96 : vector<1x32xf32>
    %125 = arith.addf %123, %124 : vector<1x32xf32>
    %126 = vector.extract_strided_slice %6 {offsets = [4, 0], sizes = [1, 128], strides = [1, 1]} : vector<8x128xf32> to vector<1x128xf32>
    %cst_26 = arith.constant dense<0.000000e+00> : vector<1x128xf32>
    %127 = tpu.matmul %125, %7, %cst_26 {dimension_numbers = #tpu.dot_dimension_numbers<[1], [0], [0], [1], [0, 0, 1, 1], [], []>} : vector<1x32xf32>, vector<32x128xf32>, vector<1x128xf32> -> vector<1x128xf32>
    %128 = arith.addf %127, %8 : vector<1x128xf32>
    %129 = vector.extract_strided_slice %126 {offsets = [0, 0], sizes = [1, 32], strides = [1, 1]} : vector<1x128xf32> to vector<1x32xf32>
    %130 = vector.extract_strided_slice %128 {offsets = [0, 0], sizes = [1, 32], strides = [1, 1]} : vector<1x128xf32> to vector<1x32xf32>
    %131 = arith.addf %129, %130 : vector<1x32xf32>
    %132 = arith.negf %131 : vector<1x32xf32>
    %133 = math.exp %132 : vector<1x32xf32>
    %cst_27 = arith.constant 1.000000e+00 : f32
    %134 = vector.broadcast %cst_27 : f32 to vector<1x32xf32>
    %135 = arith.addf %134, %133 : vector<1x32xf32>
    %136 = arith.divf %134, %135 : vector<1x32xf32>
    %137 = vector.extract_strided_slice %126 {offsets = [0, 32], sizes = [1, 32], strides = [1, 1]} : vector<1x128xf32> to vector<1x32xf32>
    %138 = vector.extract_strided_slice %128 {offsets = [0, 32], sizes = [1, 32], strides = [1, 1]} : vector<1x128xf32> to vector<1x32xf32>
    %139 = arith.addf %137, %138 : vector<1x32xf32>
    %140 = arith.negf %139 : vector<1x32xf32>
    %141 = math.exp %140 : vector<1x32xf32>
    %cst_28 = arith.constant 1.000000e+00 : f32
    %142 = vector.broadcast %cst_28 : f32 to vector<1x32xf32>
    %143 = arith.addf %142, %141 : vector<1x32xf32>
    %144 = arith.divf %142, %143 : vector<1x32xf32>
    %145 = vector.extract_strided_slice %126 {offsets = [0, 64], sizes = [1, 32], strides = [1, 1]} : vector<1x128xf32> to vector<1x32xf32>
    %146 = vector.extract_strided_slice %128 {offsets = [0, 64], sizes = [1, 32], strides = [1, 1]} : vector<1x128xf32> to vector<1x32xf32>
    %147 = arith.mulf %136, %146 : vector<1x32xf32>
    %148 = arith.addf %145, %147 : vector<1x32xf32>
    %149 = math.tanh %148 : vector<1x32xf32>
    %cst_29 = arith.constant 1.000000e+00 : f32
    %150 = vector.broadcast %cst_29 : f32 to vector<1x32xf32>
    %151 = arith.subf %150, %144 : vector<1x32xf32>
    %152 = arith.mulf %151, %149 : vector<1x32xf32>
    %153 = arith.mulf %144, %125 : vector<1x32xf32>
    %154 = arith.addf %152, %153 : vector<1x32xf32>
    %155 = vector.extract_strided_slice %6 {offsets = [5, 0], sizes = [1, 128], strides = [1, 1]} : vector<8x128xf32> to vector<1x128xf32>
    %cst_30 = arith.constant dense<0.000000e+00> : vector<1x128xf32>
    %156 = tpu.matmul %154, %7, %cst_30 {dimension_numbers = #tpu.dot_dimension_numbers<[1], [0], [0], [1], [0, 0, 1, 1], [], []>} : vector<1x32xf32>, vector<32x128xf32>, vector<1x128xf32> -> vector<1x128xf32>
    %157 = arith.addf %156, %8 : vector<1x128xf32>
    %158 = vector.extract_strided_slice %155 {offsets = [0, 0], sizes = [1, 32], strides = [1, 1]} : vector<1x128xf32> to vector<1x32xf32>
    %159 = vector.extract_strided_slice %157 {offsets = [0, 0], sizes = [1, 32], strides = [1, 1]} : vector<1x128xf32> to vector<1x32xf32>
    %160 = arith.addf %158, %159 : vector<1x32xf32>
    %161 = arith.negf %160 : vector<1x32xf32>
    %162 = math.exp %161 : vector<1x32xf32>
    %cst_31 = arith.constant 1.000000e+00 : f32
    %163 = vector.broadcast %cst_31 : f32 to vector<1x32xf32>
    %164 = arith.addf %163, %162 : vector<1x32xf32>
    %165 = arith.divf %163, %164 : vector<1x32xf32>
    %166 = vector.extract_strided_slice %155 {offsets = [0, 32], sizes = [1, 32], strides = [1, 1]} : vector<1x128xf32> to vector<1x32xf32>
    %167 = vector.extract_strided_slice %157 {offsets = [0, 32], sizes = [1, 32], strides = [1, 1]} : vector<1x128xf32> to vector<1x32xf32>
    %168 = arith.addf %166, %167 : vector<1x32xf32>
    %169 = arith.negf %168 : vector<1x32xf32>
    %170 = math.exp %169 : vector<1x32xf32>
    %cst_32 = arith.constant 1.000000e+00 : f32
    %171 = vector.broadcast %cst_32 : f32 to vector<1x32xf32>
    %172 = arith.addf %171, %170 : vector<1x32xf32>
    %173 = arith.divf %171, %172 : vector<1x32xf32>
    %174 = vector.extract_strided_slice %155 {offsets = [0, 64], sizes = [1, 32], strides = [1, 1]} : vector<1x128xf32> to vector<1x32xf32>
    %175 = vector.extract_strided_slice %157 {offsets = [0, 64], sizes = [1, 32], strides = [1, 1]} : vector<1x128xf32> to vector<1x32xf32>
    %176 = arith.mulf %165, %175 : vector<1x32xf32>
    %177 = arith.addf %174, %176 : vector<1x32xf32>
    %178 = math.tanh %177 : vector<1x32xf32>
    %cst_33 = arith.constant 1.000000e+00 : f32
    %179 = vector.broadcast %cst_33 : f32 to vector<1x32xf32>
    %180 = arith.subf %179, %173 : vector<1x32xf32>
    %181 = arith.mulf %180, %178 : vector<1x32xf32>
    %182 = arith.mulf %173, %154 : vector<1x32xf32>
    %183 = arith.addf %181, %182 : vector<1x32xf32>
    %184 = vector.extract_strided_slice %6 {offsets = [6, 0], sizes = [1, 128], strides = [1, 1]} : vector<8x128xf32> to vector<1x128xf32>
    %cst_34 = arith.constant dense<0.000000e+00> : vector<1x128xf32>
    %185 = tpu.matmul %183, %7, %cst_34 {dimension_numbers = #tpu.dot_dimension_numbers<[1], [0], [0], [1], [0, 0, 1, 1], [], []>} : vector<1x32xf32>, vector<32x128xf32>, vector<1x128xf32> -> vector<1x128xf32>
    %186 = arith.addf %185, %8 : vector<1x128xf32>
    %187 = vector.extract_strided_slice %184 {offsets = [0, 0], sizes = [1, 32], strides = [1, 1]} : vector<1x128xf32> to vector<1x32xf32>
    %188 = vector.extract_strided_slice %186 {offsets = [0, 0], sizes = [1, 32], strides = [1, 1]} : vector<1x128xf32> to vector<1x32xf32>
    %189 = arith.addf %187, %188 : vector<1x32xf32>
    %190 = arith.negf %189 : vector<1x32xf32>
    %191 = math.exp %190 : vector<1x32xf32>
    %cst_35 = arith.constant 1.000000e+00 : f32
    %192 = vector.broadcast %cst_35 : f32 to vector<1x32xf32>
    %193 = arith.addf %192, %191 : vector<1x32xf32>
    %194 = arith.divf %192, %193 : vector<1x32xf32>
    %195 = vector.extract_strided_slice %184 {offsets = [0, 32], sizes = [1, 32], strides = [1, 1]} : vector<1x128xf32> to vector<1x32xf32>
    %196 = vector.extract_strided_slice %186 {offsets = [0, 32], sizes = [1, 32], strides = [1, 1]} : vector<1x128xf32> to vector<1x32xf32>
    %197 = arith.addf %195, %196 : vector<1x32xf32>
    %198 = arith.negf %197 : vector<1x32xf32>
    %199 = math.exp %198 : vector<1x32xf32>
    %cst_36 = arith.constant 1.000000e+00 : f32
    %200 = vector.broadcast %cst_36 : f32 to vector<1x32xf32>
    %201 = arith.addf %200, %199 : vector<1x32xf32>
    %202 = arith.divf %200, %201 : vector<1x32xf32>
    %203 = vector.extract_strided_slice %184 {offsets = [0, 64], sizes = [1, 32], strides = [1, 1]} : vector<1x128xf32> to vector<1x32xf32>
    %204 = vector.extract_strided_slice %186 {offsets = [0, 64], sizes = [1, 32], strides = [1, 1]} : vector<1x128xf32> to vector<1x32xf32>
    %205 = arith.mulf %194, %204 : vector<1x32xf32>
    %206 = arith.addf %203, %205 : vector<1x32xf32>
    %207 = math.tanh %206 : vector<1x32xf32>
    %cst_37 = arith.constant 1.000000e+00 : f32
    %208 = vector.broadcast %cst_37 : f32 to vector<1x32xf32>
    %209 = arith.subf %208, %202 : vector<1x32xf32>
    %210 = arith.mulf %209, %207 : vector<1x32xf32>
    %211 = arith.mulf %202, %183 : vector<1x32xf32>
    %212 = arith.addf %210, %211 : vector<1x32xf32>
    %213 = vector.extract_strided_slice %6 {offsets = [7, 0], sizes = [1, 128], strides = [1, 1]} : vector<8x128xf32> to vector<1x128xf32>
    %cst_38 = arith.constant dense<0.000000e+00> : vector<1x128xf32>
    %214 = tpu.matmul %212, %7, %cst_38 {dimension_numbers = #tpu.dot_dimension_numbers<[1], [0], [0], [1], [0, 0, 1, 1], [], []>} : vector<1x32xf32>, vector<32x128xf32>, vector<1x128xf32> -> vector<1x128xf32>
    %215 = arith.addf %214, %8 : vector<1x128xf32>
    %216 = vector.extract_strided_slice %213 {offsets = [0, 0], sizes = [1, 32], strides = [1, 1]} : vector<1x128xf32> to vector<1x32xf32>
    %217 = vector.extract_strided_slice %215 {offsets = [0, 0], sizes = [1, 32], strides = [1, 1]} : vector<1x128xf32> to vector<1x32xf32>
    %218 = arith.addf %216, %217 : vector<1x32xf32>
    %219 = arith.negf %218 : vector<1x32xf32>
    %220 = math.exp %219 : vector<1x32xf32>
    %cst_39 = arith.constant 1.000000e+00 : f32
    %221 = vector.broadcast %cst_39 : f32 to vector<1x32xf32>
    %222 = arith.addf %221, %220 : vector<1x32xf32>
    %223 = arith.divf %221, %222 : vector<1x32xf32>
    %224 = vector.extract_strided_slice %213 {offsets = [0, 32], sizes = [1, 32], strides = [1, 1]} : vector<1x128xf32> to vector<1x32xf32>
    %225 = vector.extract_strided_slice %215 {offsets = [0, 32], sizes = [1, 32], strides = [1, 1]} : vector<1x128xf32> to vector<1x32xf32>
    %226 = arith.addf %224, %225 : vector<1x32xf32>
    %227 = arith.negf %226 : vector<1x32xf32>
    %228 = math.exp %227 : vector<1x32xf32>
    %cst_40 = arith.constant 1.000000e+00 : f32
    %229 = vector.broadcast %cst_40 : f32 to vector<1x32xf32>
    %230 = arith.addf %229, %228 : vector<1x32xf32>
    %231 = arith.divf %229, %230 : vector<1x32xf32>
    %232 = vector.extract_strided_slice %213 {offsets = [0, 64], sizes = [1, 32], strides = [1, 1]} : vector<1x128xf32> to vector<1x32xf32>
    %233 = vector.extract_strided_slice %215 {offsets = [0, 64], sizes = [1, 32], strides = [1, 1]} : vector<1x128xf32> to vector<1x32xf32>
    %234 = arith.mulf %223, %233 : vector<1x32xf32>
    %235 = arith.addf %232, %234 : vector<1x32xf32>
    %236 = math.tanh %235 : vector<1x32xf32>
    %cst_41 = arith.constant 1.000000e+00 : f32
    %237 = vector.broadcast %cst_41 : f32 to vector<1x32xf32>
    %238 = arith.subf %237, %231 : vector<1x32xf32>
    %239 = arith.mulf %238, %236 : vector<1x32xf32>
    %240 = arith.mulf %231, %212 : vector<1x32xf32>
    %241 = arith.addf %239, %240 : vector<1x32xf32>
    %242 = tpu.concatenate %1, %241 in 1 : vector<1x32xf32>, vector<1x32xf32> -> vector<1x64xf32>
    %c0_42 = arith.constant 0 : index
    %c0_43 = arith.constant 0 : index
    %243 = vector.load %arg4[%c0_42, %c0_43] : memref<65x64xf32, #tpu.memory_space<vmem>>, vector<64x64xf32>
    %cst_44 = arith.constant dense<0.000000e+00> : vector<1x64xf32>
    %244 = tpu.matmul %242, %243, %cst_44 {dimension_numbers = #tpu.dot_dimension_numbers<[1], [0], [0], [1], [0, 0, 1, 1], [], []>} : vector<1x64xf32>, vector<64x64xf32>, vector<1x64xf32> -> vector<1x64xf32>
    %c64 = arith.constant 64 : index
    %c0_45 = arith.constant 0 : index
    %245 = vector.load %arg4[%c64, %c0_45] : memref<65x64xf32, #tpu.memory_space<vmem>>, vector<1x64xf32>
    %246 = arith.addf %244, %245 : vector<1x64xf32>
    %cst_46 = arith.constant 0.000000e+00 : f32
    %247 = vector.broadcast %cst_46 : f32 to vector<1x64xf32>
    %248 = arith.maximumf %246, %247 : vector<1x64xf32>
    %249 = arith.addf %248, %242 : vector<1x64xf32>
    %c0_47 = arith.constant 0 : index
    %c0_48 = arith.constant 0 : index
    %250 = vector.load %arg5[%c0_47, %c0_48] : memref<65x64xf32, #tpu.memory_space<vmem>>, vector<64x64xf32>
    %cst_49 = arith.constant dense<0.000000e+00> : vector<1x64xf32>
    %251 = tpu.matmul %249, %250, %cst_49 {dimension_numbers = #tpu.dot_dimension_numbers<[1], [0], [0], [1], [0, 0, 1, 1], [], []>} : vector<1x64xf32>, vector<64x64xf32>, vector<1x64xf32> -> vector<1x64xf32>
    %c64_50 = arith.constant 64 : index
    %c0_51 = arith.constant 0 : index
    %252 = vector.load %arg5[%c64_50, %c0_51] : memref<65x64xf32, #tpu.memory_space<vmem>>, vector<1x64xf32>
    %253 = arith.addf %251, %252 : vector<1x64xf32>
    %cst_52 = arith.constant 0.000000e+00 : f32
    %254 = vector.broadcast %cst_52 : f32 to vector<1x64xf32>
    %255 = arith.maximumf %253, %254 : vector<1x64xf32>
    %256 = arith.addf %255, %249 : vector<1x64xf32>
    %c0_53 = arith.constant 0 : index
    %c0_54 = arith.constant 0 : index
    %257 = vector.load %arg6[%c0_53, %c0_54] : memref<65x128xf32, #tpu.memory_space<vmem>>, vector<64x128xf32>
    %cst_55 = arith.constant dense<0.000000e+00> : vector<1x128xf32>
    %258 = tpu.matmul %256, %257, %cst_55 {dimension_numbers = #tpu.dot_dimension_numbers<[1], [0], [0], [1], [0, 0, 1, 1], [], []>} : vector<1x64xf32>, vector<64x128xf32>, vector<1x128xf32> -> vector<1x128xf32>
    %c64_56 = arith.constant 64 : index
    %c0_57 = arith.constant 0 : index
    %259 = vector.load %arg6[%c64_56, %c0_57] : memref<65x128xf32, #tpu.memory_space<vmem>>, vector<1x128xf32>
    %260 = arith.addf %258, %259 : vector<1x128xf32>
    %261 = arith.negf %260 : vector<1x128xf32>
    %262 = math.exp %261 : vector<1x128xf32>
    %cst_58 = arith.constant 1.000000e+00 : f32
    %263 = vector.broadcast %cst_58 : f32 to vector<1x128xf32>
    %264 = arith.addf %263, %262 : vector<1x128xf32>
    %265 = arith.divf %263, %264 : vector<1x128xf32>
    %c0_59 = arith.constant 0 : index
    %c0_60 = arith.constant 0 : index
    %266 = vector.load %arg7[%c0_59, %c0_60] : memref<1x128xf32, #tpu.memory_space<vmem>>, vector<1x128xf32>
    tpu.vector_store %arg7[%c0_59, %c0_60], %265 {strides = array<i32>} : memref<1x128xf32, #tpu.memory_space<vmem>>, vector<1x128xf32>,
    return
  }
  func.func @transform_0(%arg0: i32) -> (i32, i32) {
    %c0_i32 = arith.constant 0 : i32
    %c0_i32_0 = arith.constant 0 : i32
    %c0_i32_1 = arith.constant 0 : i32
    return %c0_i32, %c0_i32_0 : i32, i32
  }
  func.func @transform_1(%arg0: i32) -> (i32, i32) {
    %c0_i32 = arith.constant 0 : i32
    %c0_i32_0 = arith.constant 0 : i32
    %c0_i32_1 = arith.constant 0 : i32
    return %c0_i32, %c0_i32_0 : i32, i32
  }
  func.func @transform_2(%arg0: i32) -> (i32, i32) {
    %c0_i32 = arith.constant 0 : i32
    %c0_i32_0 = arith.constant 0 : i32
    %c0_i32_1 = arith.constant 0 : i32
    return %c0_i32, %c0_i32_0 : i32, i32
  }
  func.func @transform_3(%arg0: i32) -> (i32, i32) {
    %c0_i32 = arith.constant 0 : i32
    %c0_i32_0 = arith.constant 0 : i32
    %c0_i32_1 = arith.constant 0 : i32
    return %c0_i32, %c0_i32_0 : i32, i32
  }
  func.func @transform_4(%arg0: i32) -> (i32, i32) {
    %c0_i32 = arith.constant 0 : i32
    %c0_i32_0 = arith.constant 0 : i32
    %c0_i32_1 = arith.constant 0 : i32
    return %c0_i32, %c0_i32_0 : i32, i32
  }
  func.func @transform_5(%arg0: i32) -> (i32, i32) {
    %c0_i32 = arith.constant 0 : i32
    %c0_i32_0 = arith.constant 0 : i32
    %c0_i32_1 = arith.constant 0 : i32
    return %c0_i32, %c0_i32_0 : i32, i32
  }
  func.func @transform_6(%arg0: i32) -> (i32, i32) {
    %c0_i32 = arith.constant 0 : i32
    %c0_i32_0 = arith.constant 0 : i32
    %c0_i32_1 = arith.constant 0 : i32
    return %c0_i32, %c0_i32_0 : i32, i32
  }
}

</mosaic_0001>

<bundles_post_ra>
// kernel: build_model_forward.1
= control target key start
LH: loop header
LB: loop body
LE: loop exit
PB: predicated region body
PF: predicated region fallthrough
CT: control target
= control target key end

     0   :  { %v1651_v3 = vmov 0.0|0.0   ;;  %vm1652_vm0 = vmmov 0   ;;  %v1653_v11 = vmov 0.0   ;;  %s1967_s0 = inlined_call_operand.vmem [shape: f32[9,32], index: 0, kind: input, shape index: {}]   ;;  %s1968_s1 = inlined_call_operand.vmem [shape: f32[33,128], index: 1, kind: input, shape index: {}]   ;;  %s1969_s2 = inlined_call_operand.vmem [shape: f32[33,128], index: 2, kind: input, shape index: {}]   ;;  %s1970_s3 = inlined_call_operand.vmem [shape: f32[65,64], index: 3, kind: input, shape index: {}]   ;;  %s1971_s4 = inlined_call_operand.vmem [shape: f32[65,64], index: 4, kind: input, shape index: {}]   ;;  %s1972_s5 = inlined_call_operand.vmem [shape: f32[65,128], index: 5, kind: input, shape index: {}]   ;;  %s1973_s6 = inlined_call_operand.hbm [shape: f32[1,128], index: 6, kind: output, shape index: {}]  }
   0x1   :  { %v26_v0 = vld [vmem:[%s1968_s1] sm:$0xff]  ;;  %v27_v1 = vld [vmem:[%s1968_s1 + $0x8] sm:$0xff]  ;;  %1479 = vmatprep.subr.bf16.mxu0 %v1651_v3  ;;  %1485 = vmatprep.subr.bf16.mxu1 %v1651_v3  ;;  %v28_v6 = vld [vmem:[%s1968_s1 + $0x10] sm:$0xff] }
   0x2   :  { %v109_v2 = vld [vmem:[%s1969_s2] sm:$0xff]  ;;  %v1480_v4 = vpack.c.bf16 %v27_v1, %v26_v0  ;;  %v110_v5 = vld [vmem:[%s1969_s2 + $0x8] sm:$0xff]  ;;  %v29_v7 = vld [vmem:[%s1968_s1 + $0x18] sm:$0xff]  ;;  %1331 = vmatprep.mubr.msk.f32.mxu0 %vm1652_vm0, %v1653_v11  ;;  %1342 = vmatprep.mubr.msk.f32.mxu1 %vm1652_vm0, %v1653_v11 }
   0x3   :  { %v1712_v8 = vpack.c.bf16 %v110_v5, %v109_v2  ;;  %v111_v9 = vld [vmem:[%s1969_s2 + $0x10] sm:$0xff]  ;;  %v112_v10 = vld [vmem:[%s1969_s2 + $0x18] sm:$0xff]  ;;  %v1483_v12 = vpack.c.bf16 %v29_v7, %v28_v6 }
   0x4   :  { %1481 = vmatpush3.bf16.msra.mxu0 %v1480_v4 }
   0x5   :  { %11 = vsyncpa [#allocation3], 0  ;;  %1487 = vmatpush3.bf16.msra.mxu1 %v1712_v8  ;;  %1482 = vmatprep.subr.bf16.mxu0 %v1651_v3  ;;  %v1726_v13 = vpack.c.bf16 %v112_v10, %v111_v9  ;;  %v24_v14 = vld [vmem:[%s1967_s0] sm:$0xff]  ;;  %vm35_vm1 = vcmask 261120   ;;  %s1654_s17 = smov 64   ;;  %vm967_vm2 = vcmask 523264  }
   0x6   :  { %1488 = vmatprep.subr.bf16.mxu1 %v1651_v3  ;;  %v1752_v15 = vld [vmem:[%s1969_s2 + $0x20] sm:$0x1] }
   0x7   :  { %v1230_v21 = vld [vmem:[%s1968_s1 + $0x20] ss:$0 sm:$0xff]  ;;  %s1655_s1 = smov 96  }
   0x8   :  { %1484 = vmatpush3.bf16.msra.mxu0 %v1483_v12 }
   0x9   :  { %1490 = vmatpush3.bf16.msra.mxu1 %v1726_v13  ;;  %1491 = vmatprep.subr.bf16.mxu0 %v1651_v3 }
   0xa   :  { %1497 = vmatprep.subr.bf16.mxu1 %v1651_v3 }
   0xb   :  { %1332 = vmatmul.mubr.msk.f32.vlgmr.msra.gmra.mrb[0].mxu0 %vm35_vm1, %v24_v14 }
   0xc   :  { %1343 = vmatmul.mubr.f32.vlgmr.msra.gmra.mrb[0].mxu1 %v1653_v11  ;;  %1493 = vmatpush3.bf16.msra.mxu0 %v1712_v8 }
   0xd   :  { %1494 = vmatprep.subr.bf16.mxu0 %v1651_v3  ;;  %1353 = vmatprep.mubr.msk.f32.mxu0 %vm1652_vm0, %v1653_v11 }
   0xe   :  { %1499 = vmatpush3.bf16.msra.mxu1 %v1712_v8  ;;  %1364 = vmatprep.mubr.msk.f32.mxu1 %vm1652_vm0, %v1653_v11 }
   0xf   :  { %1500 = vmatprep.subr.bf16.mxu1 %v1651_v3 }
  0x10   :  { %1496 = vmatpush3.bf16.msra.mxu0 %v1726_v13 }
  0x11   :  { %1503 = vmatprep.subr.bf16.mxu0 %v1651_v3 }
  0x12   :  { %1502 = vmatpush3.bf16.msra.mxu1 %v1726_v13 }
  0x13   :  { %1509 = vmatprep.subr.bf16.mxu1 %v1651_v3 }
  0xde   :  { %v105_v16 = vpop.f32.mrb[0].mxu0 }
  0xdf   :  { %v183_v17 = vpop.f32.mrb[0].mxu1  ;;  %v1333_v18 = vpop.f32.mrb[1].mxu0  ;;  %v1759_v22 = vadd.f32 %v1230_v21, %v105_v16 }
  0xe0   :  { %v184_v19 = vadd.f32 %v183_v17, %v1752_v15  ;;  %v1344_v20 = vpop.f32.mrb[1].mxu1 }
  0xe2   :  { %195 = vrot.lane.b32.xlu0 %v184_v19, %s1654_s17  ;;  %v187_v23 = vadd.f32 %v184_v19, %v1759_v22 }
  0xe4   :  { %v1232_v24 = vmul.f32 -1.442695, %v187_v23 }
  0xe6   :  { %1575 = vpow2.f32 %v1232_v24 }
  0xf0   :  { %v1576_v25 = vpop.eup %1575 }
  0xf1   :  { %v191_v26 = vadd.f32 1.0, %v1576_v25 }
  0xf3   :  { %1577 = vrcp.f32 %v191_v26 }
  0xfd   :  { %v1578_v27 = vpop.eup %1577 }
  0xfe   :  { %v205_v33 = vsub.f32 1.0, %v1578_v27  ;;  %v211_v35 = vmul.f32 0.0, %v1578_v27 }
 0x154   :  { %v196_v28 = vpop.permute.xlu0 %195 }
 0x155   :  { %v198_v29 = vmul.f32 %v1578_v27, %v196_v28 }
 0x157   :  { %200 = vrot.lane.b32.xlu0 %v198_v29, %s1654_s17 }
 0x1c9   :  { %v201_v30 = vpop.permute.xlu0 %200 }
 0x1ca   :  { %v203_v31 = vadd.f32 %v201_v30, %v1759_v22 }
 0x1cc   :  { %1579 = vtanh.f32 %v203_v31 }
 0x1d6   :  { %v1580_v32 = vpop.eup %1579 }
 0x1d7   :  { %207 = vrot.lane.b32.xlu1 %v1580_v32, %s1655_s1 }
 0x249   :  { %v208_v34 = vpop.permute.xlu1 %207 }
 0x24a   :  { %v210_v36 = vmul.f32 %v208_v34, %v205_v33 }
 0x24c   :  { %v212_v37 = vadd.f32 %v211_v35, %v210_v36 }
 0x24e   :  { %214 = vrot.lane.b32.xlu1 %v212_v37, %s1655_s1  ;;  %v314_v53 = vrot.slane %v212_v37, 7 }
 0x2c0   :  { %v215_v38 = vpop.permute.xlu1 %214 }
 0x2c1   :  { %1354 = vmatmul.mubr.msk.f32.vlgmr.msra.gmra.mrb[2].mxu0 %vm35_vm1, %v215_v38 }
 0x2c2   :  { %1505 = vmatpush3.bf16.msra.mxu0 %v1712_v8  ;;  %1375 = vmatprep.mubr.msk.f32.mxu0 %vm1652_vm0, %v1653_v11 }
 0x2c3   :  { %1506 = vmatprep.subr.bf16.mxu0 %v1651_v3 }
 0x2c6   :  { %1508 = vmatpush3.bf16.msra.mxu0 %v1726_v13 }
 0x2c7   :  { %1515 = vmatprep.subr.bf16.mxu0 %v1651_v3 }
 0x394   :  { %v284_v39 = vpop.f32.mrb[2].mxu0 }
 0x395   :  { %v285_v40 = vadd.f32 %v284_v39, %v1752_v15  ;;  %v1355_v41 = vpop.f32.mrb[3].mxu0 }
 0x397   :  { %v289_v42 = vrot.slane %v285_v40, 7 }
 0x399   :  { %298 = vrot.lane.b32.xlu0 %v289_v42, %s1654_s17  ;;  %v291_v43 = vadd.f32 %v289_v42, %v1759_v22 }
 0x39b   :  { %v1234_v44 = vmul.f32 -1.442695, %v291_v43 }
 0x39d   :  { %1581 = vpow2.f32 %v1234_v44 }
 0x3a7   :  { %v1582_v45 = vpop.eup %1581 }
 0x3a8   :  { %v295_v46 = vadd.f32 1.0, %v1582_v45 }
 0x3aa   :  { %1583 = vrcp.f32 %v295_v46 }
 0x3b4   :  { %v1584_v47 = vpop.eup %1583 }
 0x3b5   :  { %v308_v54 = vsub.f32 1.0, %v1584_v47  ;;  %v316_v56 = vmul.f32 %v1584_v47, %v314_v53 }
 0x40b   :  { %v299_v48 = vpop.permute.xlu0 %298 }
 0x40c   :  { %v301_v49 = vmul.f32 %v1584_v47, %v299_v48 }
 0x40e   :  { %303 = vrot.lane.b32.xlu1 %v301_v49, %s1654_s17 }
 0x480   :  { %v304_v50 = vpop.permute.xlu1 %303 }
 0x481   :  { %v306_v51 = vadd.f32 %v304_v50, %v1759_v22 }
 0x483   :  { %1585 = vtanh.f32 %v306_v51 }
 0x48d   :  { %v1586_v52 = vpop.eup %1585 }
 0x48e   :  { %310 = vrot.lane.b32.xlu0 %v1586_v52, %s1655_s1 }
 0x500   :  { %v311_v55 = vpop.permute.xlu0 %310 }
 0x501   :  { %v313_v57 = vmul.f32 %v311_v55, %v308_v54 }
 0x503   :  { %v317_v58 = vadd.f32 %v316_v56, %v313_v57 }
 0x505   :  { %v319_v59 = vrot.slane %v317_v58, 1  ;;  %v420_v16 = vrot.slane %v317_v58, 7 }
 0x507   :  { %320 = vrot.lane.b32.xlu1 %v319_v59, %s1655_s1 }
 0x579   :  { %v321_v60 = vpop.permute.xlu1 %320 }
 0x57a   :  { %1365 = vmatmul.mubr.msk.f32.vlgmr.msra.gmra.mrb[2].mxu1 %vm35_vm1, %v321_v60 }
 0x57b   :  { %1511 = vmatpush3.bf16.msra.mxu1 %v1712_v8  ;;  %1386 = vmatprep.mubr.msk.f32.mxu1 %vm1652_vm0, %v1653_v11 }
 0x57c   :  { %1512 = vmatprep.subr.bf16.mxu1 %v1651_v3 }
 0x57f   :  { %1514 = vmatpush3.bf16.msra.mxu1 %v1726_v13 }
 0x580   :  { %1521 = vmatprep.subr.bf16.mxu1 %v1651_v3 }
 0x64d   :  { %v390_v61 = vpop.f32.mrb[2].mxu1 }
 0x64e   :  { %v391_v62 = vadd.f32 %v390_v61, %v1752_v15  ;;  %v1366_v63 = vpop.f32.mrb[3].mxu1 }
 0x650   :  { %v395_v0 = vrot.slane %v391_v62, 6 }
 0x652   :  { %404 = vrot.lane.b32.xlu0 %v395_v0, %s1654_s17  ;;  %v397_v1 = vadd.f32 %v395_v0, %v1759_v22 }
 0x654   :  { %v1236_v2 = vmul.f32 -1.442695, %v397_v1 }
 0x656   :  { %1587 = vpow2.f32 %v1236_v2 }
 0x660   :  { %v1588_v4 = vpop.eup %1587 }
 0x661   :  { %v401_v5 = vadd.f32 1.0, %v1588_v4 }
 0x663   :  { %1589 = vrcp.f32 %v401_v5 }
 0x66d   :  { %v1590_v6 = vpop.eup %1589 }
 0x66e   :  { %v414_v17 = vsub.f32 1.0, %v1590_v6  ;;  %v422_v19 = vmul.f32 %v1590_v6, %v420_v16 }
 0x6c4   :  { %v405_v7 = vpop.permute.xlu0 %404 }
 0x6c5   :  { %v407_v9 = vmul.f32 %v1590_v6, %v405_v7 }
 0x6c7   :  { %409 = vrot.lane.b32.xlu1 %v407_v9, %s1654_s17 }
 0x739   :  { %v410_v10 = vpop.permute.xlu1 %409 }
 0x73a   :  { %v412_v12 = vadd.f32 %v410_v10, %v1759_v22 }
 0x73c   :  { %1591 = vtanh.f32 %v412_v12 }
 0x746   :  { %v1592_v14 = vpop.eup %1591 }
 0x747   :  { %416 = vrot.lane.b32.xlu0 %v1592_v14, %s1655_s1 }
 0x7b9   :  { %v417_v18 = vpop.permute.xlu0 %416 }
 0x7ba   :  { %v419_v20 = vmul.f32 %v417_v18, %v414_v17 }
 0x7bc   :  { %v423_v21 = vadd.f32 %v422_v19, %v419_v20 }
 0x7be   :  { %v425_v23 = vrot.slane %v423_v21, 2  ;;  %v526_v39 = vrot.slane %v423_v21, 7 }
 0x7c0   :  { %426 = vrot.lane.b32.xlu1 %v425_v23, %s1655_s1 }
 0x832   :  { %v427_v24 = vpop.permute.xlu1 %426 }
 0x833   :  { %1376 = vmatmul.mubr.msk.f32.vlgmr.msra.gmra.mrb[4].mxu0 %vm35_vm1, %v427_v24 }
 0x834   :  { %1517 = vmatpush3.bf16.msra.mxu0 %v1712_v8  ;;  %1397 = vmatprep.mubr.msk.f32.mxu0 %vm1652_vm0, %v1653_v11 }
 0x835   :  { %1518 = vmatprep.subr.bf16.mxu0 %v1651_v3 }
 0x838   :  { %1520 = vmatpush3.bf16.msra.mxu0 %v1726_v13 }
 0x839   :  { %1527 = vmatprep.subr.bf16.mxu0 %v1651_v3 }
 0x906   :  { %v496_v25 = vpop.f32.mrb[4].mxu0 }
 0x907   :  { %v497_v26 = vadd.f32 %v496_v25, %v1752_v15  ;;  %v1377_v27 = vpop.f32.mrb[5].mxu0 }
 0x909   :  { %v501_v28 = vrot.slane %v497_v26, 5 }
 0x90b   :  { %510 = vrot.lane.b32.xlu0 %v501_v28, %s1654_s17  ;;  %v503_v29 = vadd.f32 %v501_v28, %v1759_v22 }
 0x90d   :  { %v1238_v30 = vmul.f32 -1.442695, %v503_v29 }
 0x90f   :  { %1593 = vpow2.f32 %v1238_v30 }
 0x919   :  { %v1594_v31 = vpop.eup %1593 }
 0x91a   :  { %v507_v32 = vadd.f32 1.0, %v1594_v31 }
 0x91c   :  { %1595 = vrcp.f32 %v507_v32 }
 0x926   :  { %v1596_v33 = vpop.eup %1595 }
 0x927   :  { %v520_v40 = vsub.f32 1.0, %v1596_v33  ;;  %v528_v42 = vmul.f32 %v1596_v33, %v526_v39 }
 0x97d   :  { %v511_v34 = vpop.permute.xlu0 %510 }
 0x97e   :  { %v513_v35 = vmul.f32 %v1596_v33, %v511_v34 }
 0x980   :  { %515 = vrot.lane.b32.xlu1 %v513_v35, %s1654_s17 }
 0x9f2   :  { %v516_v36 = vpop.permute.xlu1 %515 }
 0x9f3   :  { %v518_v37 = vadd.f32 %v516_v36, %v1759_v22 }
 0x9f5   :  { %1597 = vtanh.f32 %v518_v37 }
 0x9ff   :  { %v1598_v38 = vpop.eup %1597 }
 0xa00   :  { %522 = vrot.lane.b32.xlu0 %v1598_v38, %s1655_s1 }
 0xa72   :  { %v523_v41 = vpop.permute.xlu0 %522 }
 0xa73   :  { %v525_v43 = vmul.f32 %v523_v41, %v520_v40 }
 0xa75   :  { %v529_v44 = vadd.f32 %v528_v42, %v525_v43 }
 0xa77   :  { %v531_v45 = vrot.slane %v529_v44, 3  ;;  %v632_v61 = vrot.slane %v529_v44, 7 }
 0xa79   :  { %532 = vrot.lane.b32.xlu1 %v531_v45, %s1655_s1 }
 0xaeb   :  { %v533_v46 = vpop.permute.xlu1 %532 }
 0xaec   :  { %1387 = vmatmul.mubr.msk.f32.vlgmr.msra.gmra.mrb[4].mxu1 %vm35_vm1, %v533_v46 }
 0xaed   :  { %1523 = vmatpush3.bf16.msra.mxu1 %v1712_v8  ;;  %1408 = vmatprep.mubr.msk.f32.mxu1 %vm1652_vm0, %v1653_v11 }
 0xaee   :  { %1524 = vmatprep.subr.bf16.mxu1 %v1651_v3 }
 0xaf1   :  { %1526 = vmatpush3.bf16.msra.mxu1 %v1726_v13 }
 0xaf2   :  { %1533 = vmatprep.subr.bf16.mxu1 %v1651_v3 }
 0xbbf   :  { %v602_v47 = vpop.f32.mrb[4].mxu1 }
 0xbc0   :  { %v603_v48 = vadd.f32 %v602_v47, %v1752_v15  ;;  %v1388_v49 = vpop.f32.mrb[5].mxu1 }
 0xbc2   :  { %v607_v50 = vrot.slane %v603_v48, 4 }
 0xbc4   :  { %616 = vrot.lane.b32.xlu0 %v607_v50, %s1654_s17  ;;  %v609_v51 = vadd.f32 %v607_v50, %v1759_v22 }
 0xbc6   :  { %v1240_v52 = vmul.f32 -1.442695, %v609_v51 }
 0xbc8   :  { %1599 = vpow2.f32 %v1240_v52 }
 0xbd2   :  { %v1600_v53 = vpop.eup %1599 }
 0xbd3   :  { %v613_v54 = vadd.f32 1.0, %v1600_v53 }
 0xbd5   :  { %1601 = vrcp.f32 %v613_v54 }
 0xbdf   :  { %v1602_v55 = vpop.eup %1601 }
 0xbe0   :  { %v626_v62 = vsub.f32 1.0, %v1602_v55  ;;  %v634_v0 = vmul.f32 %v1602_v55, %v632_v61 }
 0xc36   :  { %v617_v56 = vpop.permute.xlu0 %616 }
 0xc37   :  { %v619_v57 = vmul.f32 %v1602_v55, %v617_v56 }
 0xc39   :  { %621 = vrot.lane.b32.xlu1 %v619_v57, %s1654_s17 }
 0xcab   :  { %v622_v58 = vpop.permute.xlu1 %621 }
 0xcac   :  { %v624_v59 = vadd.f32 %v622_v58, %v1759_v22 }
 0xcae   :  { %1603 = vtanh.f32 %v624_v59 }
 0xcb8   :  { %v1604_v60 = vpop.eup %1603 }
 0xcb9   :  { %628 = vrot.lane.b32.xlu0 %v1604_v60, %s1655_s1 }
 0xd2b   :  { %v629_v63 = vpop.permute.xlu0 %628 }
 0xd2c   :  { %v631_v1 = vmul.f32 %v629_v63, %v626_v62 }
 0xd2e   :  { %v635_v2 = vadd.f32 %v634_v0, %v631_v1  ;;  %v959_v0 = vld [vmem:[%s1970_s3 + $0x8] sm:$0xff]  ;;  %v960_v1 = vld [vmem:[%s1970_s3 + $0x10] sm:$0xff] }
 0xd30   :  { %v637_v4 = vrot.slane %v635_v2, 4  ;;  %v738_v23 = vrot.slane %v635_v2, 7 }
 0xd32   :  { %638 = vrot.lane.b32.xlu1 %v637_v4, %s1655_s1  ;;  %v961_v4 = vld [vmem:[%s1970_s3 + $0x18] sm:$0xff] }
 0xda4   :  { %v639_v5 = vpop.permute.xlu1 %638 }
 0xda5   :  { %1398 = vmatmul.mubr.msk.f32.vlgmr.msra.gmra.mrb[6].mxu0 %vm35_vm1, %v639_v5  ;;  %v1537_v5 = vpack.c.bf16 %v961_v4, %v960_v1 }
 0xda6   :  { %1529 = vmatpush3.bf16.msra.mxu0 %v1712_v8  ;;  %1419 = vmatprep.mubr.msk.f32.mxu0 %vm1652_vm0, %v1653_v11 }
 0xda7   :  { %1530 = vmatprep.subr.bf16.mxu0 %v1651_v3 }
 0xdaa   :  { %1532 = vmatpush3.bf16.msra.mxu0 %v1726_v13 }
 0xdab   :  { %1545 = vmatprep.subr.bf16.mxu0 %v1651_v3 }
 0xe78   :  { %v708_v6 = vpop.f32.mrb[6].mxu0 }
 0xe79   :  { %v709_v7 = vadd.f32 %v708_v6, %v1752_v15  ;;  %v1399_v9 = vpop.f32.mrb[7].mxu0  ;;  %v962_v6 = vld [vmem:[%s1970_s3 + $0x20] sm:$0xff] }
 0xe7b   :  { %v713_v10 = vrot.slane %v709_v7, 3  ;;  %v963_v7 = vld [vmem:[%s1970_s3 + $0x28] sm:$0xff] }
 0xe7c   :  { %v1540_v9 = vpack.c.bf16 %v963_v7, %v962_v6 }
 0xe7d   :  { %722 = vrot.lane.b32.xlu0 %v713_v10, %s1654_s17  ;;  %v715_v12 = vadd.f32 %v713_v10, %v1759_v22 }
 0xe7f   :  { %v1242_v14 = vmul.f32 -1.442695, %v715_v12 }
 0xe81   :  { %1605 = vpow2.f32 %v1242_v14  ;;  %v964_v14 = vld [vmem:[%s1970_s3 + $0x30] sm:$0xff] }
 0xe8b   :  { %v1606_v8 = vpop.eup %1605 }
 0xe8c   :  { %v719_v16 = vadd.f32 1.0, %v1606_v8  ;;  %v965_v8 = vld [vmem:[%s1970_s3 + $0x38] sm:$0xff] }
 0xe8e   :  { %1607 = vrcp.f32 %v719_v16  ;;  %v1543_v16 = vpack.c.bf16 %v965_v8, %v964_v14 }
 0xe98   :  { %v1608_v17 = vpop.eup %1607 }
 0xe99   :  { %v732_v24 = vsub.f32 1.0, %v1608_v17  ;;  %v740_v26 = vmul.f32 %v1608_v17, %v738_v23 }
 0xeef   :  { %v723_v18 = vpop.permute.xlu0 %722 }
 0xef0   :  { %v725_v19 = vmul.f32 %v1608_v17, %v723_v18  ;;  %v1044_v17 = vld [vmem:[%s1971_s4 + $0x8] sm:$0xff]  ;;  %v1045_v18 = vld [vmem:[%s1971_s4 + $0x10] sm:$0xff] }
 0xef2   :  { %727 = vrot.lane.b32.xlu1 %v725_v19, %s1654_s17 }
 0xf64   :  { %v728_v13 = vpop.permute.xlu1 %727 }
 0xf65   :  { %v730_v20 = vadd.f32 %v728_v13, %v1759_v22  ;;  %v1046_v13 = vld [vmem:[%s1971_s4 + $0x18] sm:$0xff] }
 0xf67   :  { %1609 = vtanh.f32 %v730_v20  ;;  %v1549_v20 = vpack.c.bf16 %v1046_v13, %v1045_v18 }
 0xf71   :  { %v1610_v21 = vpop.eup %1609 }
 0xf72   :  { %734 = vrot.lane.b32.xlu0 %v1610_v21, %s1655_s1 }
 0xfe4   :  { %v735_v25 = vpop.permute.xlu0 %734 }
 0xfe5   :  { %v737_v27 = vmul.f32 %v735_v25, %v732_v24 }
 0xfe7   :  { %v741_v28 = vadd.f32 %v740_v26, %v737_v27 }
 0xfe9   :  { %v743_v29 = vrot.slane %v741_v28, 5  ;;  %v844_v45 = vrot.slane %v741_v28, 7 }
 0xfeb   :  { %744 = vrot.lane.b32.xlu1 %v743_v29, %s1655_s1  ;;  %v25_v29 = vld [vmem:[%s1967_s0 + $0x8] sm:$0x1] }
0x105d   :  { %v745_v30 = vpop.permute.xlu1 %744 }
0x105e   :  { %1409 = vmatmul.mubr.msk.f32.vlgmr.msra.gmra.mrb[6].mxu1 %vm35_vm1, %v745_v30 }
0x105f   :  { %1438 = vmatprep.mubr.msk.f32.mxu1 %vm1652_vm0, %v1653_v11 }
0x1131   :  { %v814_v31 = vpop.f32.mrb[6].mxu1 }
0x1132   :  { %v815_v32 = vadd.f32 %v814_v31, %v1752_v15  ;;  %v1410_v33 = vpop.f32.mrb[7].mxu1 }
0x1133   :  { %v1048_v33 = vld [vmem:[%s1971_s4 + $0x28] sm:$0xff] }
0x1134   :  { %v819_v34 = vrot.slane %v815_v32, 2  ;;  %v1047_v32 = vld [vmem:[%s1971_s4 + $0x20] sm:$0xff] }
0x1136   :  { %828 = vrot.lane.b32.xlu0 %v819_v34, %s1654_s17  ;;  %v821_v35 = vadd.f32 %v819_v34, %v1759_v22  ;;  %v1552_v34 = vpack.c.bf16 %v1048_v33, %v1047_v32 }
0x1138   :  { %v1244_v36 = vmul.f32 -1.442695, %v821_v35  ;;  %v1049_v35 = vld [vmem:[%s1971_s4 + $0x30] sm:$0xff] }
0x113a   :  { %1611 = vpow2.f32 %v1244_v36 }
0x1144   :  { %v1612_v37 = vpop.eup %1611 }
0x1145   :  { %v825_v38 = vadd.f32 1.0, %v1612_v37  ;;  %v1127_v37 = vld [vmem:[%s1972_s5] sm:$0xff] }
0x1147   :  { %1613 = vrcp.f32 %v825_v38  ;;  %v1128_v38 = vld [vmem:[%s1972_s5 + $0x8] sm:$0xff] }
0x1151   :  { %v1614_v39 = vpop.eup %1613 }
0x1152   :  { %v838_v46 = vsub.f32 1.0, %v1614_v39  ;;  %v846_v48 = vmul.f32 %v1614_v39, %v844_v45 }
0x11a8   :  { %v829_v40 = vpop.permute.xlu0 %828 }
0x11a9   :  { %v831_v41 = vmul.f32 %v1614_v39, %v829_v40  ;;  %v1129_v39 = vld [vmem:[%s1972_s5 + $0x10] sm:$0xff]  ;;  %v1558_v40 = vpack.c.bf16 %v1128_v38, %v1127_v37 }
0x11ab   :  { %833 = vrot.lane.b32.xlu1 %v831_v41, %s1654_s17  ;;  %v1130_v41 = vld [vmem:[%s1972_s5 + $0x18] sm:$0xff] }
0x121d   :  { %v834_v42 = vpop.permute.xlu1 %833 }
0x121e   :  { %v836_v43 = vadd.f32 %v834_v42, %v1759_v22  ;;  %v1561_v42 = vpack.c.bf16 %v1130_v41, %v1129_v39 }
0x1220   :  { %1615 = vtanh.f32 %v836_v43  ;;  %v966_v43 = vld [vmem:[%s1970_s3 + $0x40] sm:$0x1] }
0x122a   :  { %v1616_v44 = vpop.eup %1615 }
0x122b   :  { %840 = vrot.lane.b32.xlu0 %v1616_v44, %s1655_s1 }
0x129d   :  { %v841_v47 = vpop.permute.xlu0 %840 }
0x129e   :  { %v843_v49 = vmul.f32 %v841_v47, %v838_v46 }
0x12a0   :  { %v847_v50 = vadd.f32 %v846_v48, %v843_v49  ;;  %v1131_v49 = vld [vmem:[%s1972_s5 + $0x20] sm:$0xff] }
0x12a2   :  { %v849_v51 = vrot.slane %v847_v50, 6  ;;  %v950_v23 = vrot.slane %v847_v50, 7  ;;  %v1132_v50 = vld [vmem:[%s1972_s5 + $0x28] sm:$0xff] }
0x12a4   :  { %850 = vrot.lane.b32.xlu1 %v849_v51, %s1655_s1  ;;  %v1564_v51 = vpack.c.bf16 %v1132_v50, %v1131_v49 }
0x1316   :  { %v851_v52 = vpop.permute.xlu1 %850 }
0x1317   :  { %1420 = vmatmul.mubr.msk.f32.vlgmr.msra.gmra.mrb[8].mxu0 %vm35_vm1, %v851_v52  ;;  %v1133_v52 = vld [vmem:[%s1972_s5 + $0x30] sm:$0xff] }
0x1318   :  { %1457 = vmatprep.mubr.msk.f32.mxu0 %vm1652_vm0, %v1653_v11 }
0x13ea   :  { %v920_v53 = vpop.f32.mrb[8].mxu0 }
0x13eb   :  { %v921_v54 = vadd.f32 %v920_v53, %v1752_v15  ;;  %v1421_v55 = vpop.f32.mrb[9].mxu0  ;;  %v958_v15 = vld [vmem:[%s1970_s3] sm:$0xff]  ;;  %v1134_v53 = vld [vmem:[%s1972_s5 + $0x38] sm:$0xff] }
0x13ec   :  { %v1534_v2 = vpack.c.bf16 %v959_v0, %v958_v15  ;;  %v1051_v55 = vld [vmem:[%s1971_s4 + $0x40] sm:$0x1] }
0x13ed   :  { %v925_v56 = vrot.slane %v921_v54, 1  ;;  %v1567_v54 = vpack.c.bf16 %v1134_v53, %v1133_v52 }
0x13ee   :  { %1535 = vmatpush3.bf16.msra.mxu1 %v1534_v2 }
0x13ef   :  { %934 = vrot.lane.b32.xlu0 %v925_v56, %s1654_s17  ;;  %v927_v57 = vadd.f32 %v925_v56, %v1759_v22  ;;  %1536 = vmatprep.subr.bf16.mxu1 %v1651_v3 }
0x13f1   :  { %v1246_v58 = vmul.f32 -1.442695, %v927_v57 }
0x13f2   :  { %1538 = vmatpush3.bf16.msra.mxu1 %v1537_v5 }
0x13f3   :  { %1617 = vpow2.f32 %v1246_v58  ;;  %1539 = vmatprep.subr.bf16.mxu1 %v1651_v3 }
0x13f6   :  { %1541 = vmatpush3.bf16.msra.mxu1 %v1540_v9 }
0x13f7   :  { %1542 = vmatprep.subr.bf16.mxu1 %v1651_v3 }
0x13fa   :  { %1544 = vmatpush3.bf16.msra.mxu1 %v1543_v16 }
0x13fb   :  { %1557 = vmatprep.subr.bf16.mxu1 %v1651_v3 }
0x13fd   :  { %v1618_v59 = vpop.eup %1617 }
0x13fe   :  { %v931_v60 = vadd.f32 1.0, %v1618_v59 }
0x1400   :  { %1619 = vrcp.f32 %v931_v60 }
0x140a   :  { %v1620_v61 = vpop.eup %1619 }
0x140b   :  { %v944_v24 = vsub.f32 1.0, %v1620_v61  ;;  %v952_v26 = vmul.f32 %v1620_v61, %v950_v23 }
0x1461   :  { %v935_v62 = vpop.permute.xlu0 %934 }
0x1462   :  { %v937_v63 = vmul.f32 %v1620_v61, %v935_v62 }
0x1464   :  { %939 = vrot.lane.b32.xlu1 %v937_v63, %s1654_s17 }
0x14d6   :  { %v940_v10 = vpop.permute.xlu1 %939 }
0x14d7   :  { %v942_v12 = vadd.f32 %v940_v10, %v1759_v22  ;;  %v1043_v22 = vld [vmem:[%s1971_s4] sm:$0xff] }
0x14d8   :  { %v1546_v19 = vpack.c.bf16 %v1044_v17, %v1043_v22 }
0x14d9   :  { %1621 = vtanh.f32 %v942_v12 }
0x14da   :  { %1547 = vmatpush3.bf16.msra.mxu0 %v1546_v19 }
0x14db   :  { %1548 = vmatprep.subr.bf16.mxu0 %v1651_v3 }
0x14de   :  { %1550 = vmatpush3.bf16.msra.mxu0 %v1549_v20 }
0x14df   :  { %1551 = vmatprep.subr.bf16.mxu0 %v1651_v3 }
0x14e2   :  { %1553 = vmatpush3.bf16.msra.mxu0 %v1552_v34 }
0x14e3   :  { %v1622_v21 = vpop.eup %1621  ;;  %1554 = vmatprep.subr.bf16.mxu0 %v1651_v3 }
0x14e4   :  { %946 = vrot.lane.b32.xlu0 %v1622_v21, %s1655_s1 }
0x1556   :  { %v947_v25 = vpop.permute.xlu0 %946 }
0x1557   :  { %v949_v27 = vmul.f32 %v947_v25, %v944_v24 }
0x1559   :  { %v953_v28 = vadd.f32 %v952_v26, %v949_v27 }
0x155b   :  { %v955_v30 = vrot.slane %v953_v28, 7 }
0x155d   :  { %v957_v31 = vsel %vm35_vm1, %v25_v29, %v955_v30 }
0x155e   :  { %1439 = vmatmul.mubr.msk.f32.vlgmr.msra.gmra.mrb[8].mxu1 %vm967_vm2, %v957_v31 }
0x155f   :  { %1476 = vmatprep.mubr.msk.f32.mxu1 %vm1652_vm0, %v1653_v11  ;;  %v1050_v11 = vld [vmem:[%s1971_s4 + $0x38] sm:$0xff]  ;;  %1559 = vmatpush3.bf16.msra.mxu1 %v1558_v40  ;;  %s1656_s4 = smov [#allocation2]  }
0x1560   :  { %v1555_v36 = vpack.c.bf16 %v1050_v11, %v1049_v35  ;;  %1560 = vmatprep.subr.bf16.mxu1 %v1651_v3  ;;  %s1222_s21 = sshll.u32 %s1656_s4, 4  ;;  %s1223_s21 = int_to_ptr.vmem [resolvable:$true] %s1222_s21 }
0x1561   :  { %s1627_s22 = scalar_lea.vmem %s1223_s21, 16  ;;  %s1631_s0 = scalar_lea.vmem %s1223_s21, 32 }
0x1562   :  { %1556 = vmatpush3.bf16.msra.mxu0 %v1555_v36  ;;  %p1628_p0 = scmp.ne.s32.totalorder %s1223_s21, %s1627_s22  ;;  %p1632_p1 = scmp.lt.s32.totalorder %s1223_s21, %s1223_s21 }
0x1563   :  { %1562 = vmatpush3.bf16.msra.mxu1 %v1561_v42  ;;  %p1633_p2 = scmp.lt.s32.totalorder %s1631_s0, %s1627_s22 }
0x1564   :  { %1563 = vmatprep.subr.bf16.mxu1 %v1651_v3 }
0x1565   :  { %p1634_p3 = por %p1633_p2, %p1632_p1 }
0x1567   :  { %1565 = vmatpush3.bf16.msra.mxu1 %v1564_v51  ;;  %p1635_p4 = pnand %p1634_p3, %p1628_p0 }
0x1568   :  { %1566 = vmatprep.subr.bf16.mxu1 %v1651_v3  ;;  %v1135_v3 = vld [vmem:[%s1972_s5 + $0x40] sm:$0x1] }
0x156b   :  { %1568 = vmatpush3.bf16.msra.mxu1 %v1567_v54 }
0x1631   :  { %v1037_v44 = vpop.f32.mrb[8].mxu1 }
0x1632   :  { %v1038_v45 = vadd.f32 %v1037_v44, %v966_v43  ;;  %v1440_v46 = vpop.f32.mrb[9].mxu1 }
0x1634   :  { %v1041_v47 = vmax.f32 %v1038_v45, 0.0 }
0x1636   :  { %v1042_v48 = vadd.f32 %v1041_v47, %v957_v31 }
0x1638   :  { %1458 = vmatmul.mubr.msk.f32.vlgmr.msra.gmra.mrb[10].mxu0 %vm967_vm2, %v1042_v48 }
0x170b   :  { %v1121_v56 = vpop.f32.mrb[10].mxu0 }
0x170c   :  { %v1122_v57 = vadd.f32 %v1121_v56, %v1051_v55  ;;  %v1459_v58 = vpop.f32.mrb[11].mxu0 }
0x170e   :  { %v1125_v59 = vmax.f32 %v1122_v57, 0.0 }
0x1710   :  { %v1126_v60 = vadd.f32 %v1125_v59, %v1042_v48 }
0x1712   :  { %1477 = vmatmul.mubr.msk.f32.vlgmr.msra.gmra.mrb[10].mxu1 %vm967_vm2, %v1126_v60 }
0x17e5   :  { %v1205_v61 = vpop.f32.mrb[10].mxu1 }
0x17e6   :  { %v1206_v62 = vadd.f32 %v1205_v61, %v1135_v3  ;;  %v1478_v63 = vpop.f32.mrb[11].mxu1 }
0x17e8   :  { %v1250_v15 = vmul.f32 -1.442695, %v1206_v62 }
0x17ea   :  { %1623 = vpow2.f32 %v1250_v15 }
0x17f4   :  { %v1624_v0 = vpop.eup %1623 }
0x17f5   :  { %v1212_v1 = vadd.f32 1.0, %v1624_v0 }
0x17f7   :  { %1625 = vrcp.f32 %v1212_v1 }
0x1801   :  { %v1626_v2 = vpop.eup %1625 }
0x1802   :  { %1215 = vst [vmem:[#allocation2] sm:$0x1] %v1626_v2 }
0x1803   :  { %1638 = shalt.err (!%p1635_p4)
}
0x1804   :  { %s1639_s24 = scalar_lea.hbm %s1973_s6, 16 }
0x1805   :  { %p1640_p5 = scmp.ne.s32.totalorder %s1973_s6, %s1639_s24  ;;  %p1643_p6 = scmp.lt.u32.totalorder %s1639_s24, %s1973_s6 }
0x1807   :  { %p1645_p7 = pnand %p1643_p6, %p1640_p5 }
0x1809   :  { %1648 = shalt.err (!%p1645_p7)
}
0x180a   :  { %1225 = dma.vmem_to_hbm [thread:$0]  %s1223_s21, 16, %s1973_s6, [#allocation3]  }
0x180b   :  { %1649 = dma.done.wait [#allocation3], 16  }
0x180c   :  { %1650 = vsyncadd [#allocation3], 4294967280 }
0x180d   :  { %1229 = vsyncpa [#allocation3], 1 }

</bundles_post_ra>
